<compile_context>
chip_gen: v7x
topology: tpu7x:2x2x1
jax: 0.10.0
libtpu: 0.0.40
codegen_flags: <defaults>
</compile_context>

<pallas_src>
import functools

import jax
import jax.numpy as jnp
from jax.experimental import pallas as pl
from jax.experimental.pallas import tpu as pltpu


def _conv2d_kernel(x_ref, w_ref, b_ref, o_ref, *, TH, OW, KH, KW,
                   stride, dilation, c_in):
    """One (batch, output-row-tile) per grid step.

    x_ref : (1, Hp, Wp, Cin)        whole padded image for this batch elem
    w_ref : (KH*KW*Cin, Cout_pad)   im2col-ordered weight (zero-padded cols)
    b_ref : (1, Cout_pad)           f32 bias (zero-padded)
    o_ref : (1, TH*OW, Cout_pad)    lane-dense output tile
    """
    i = pl.program_id(1)                       # output-row-tile index
    sh, sw = stride
    dh, dw = dilation
    row0 = pl.multiple_of(i * (TH * sh), TH * sh)

    # Stack the KH*KW shifted patches along the channel axis so the whole tap
    # loop becomes a single MXU contraction with K = KH*KW*Cin.
    cols = []
    for kh in range(KH):
        for kw in range(KW):
            r0 = row0 + kh * dh
            c0 = kw * dw
            if sh == 1 and sw == 1:
                patch = x_ref[0, pl.ds(r0, TH), pl.ds(c0, OW), :]
            else:
                rows = (TH - 1) * sh + 1
                colsz = (OW - 1) * sw + 1
                win = x_ref[0, pl.ds(r0, rows), pl.ds(c0, colsz), :]
                patch = jax.lax.slice(win, (0, 0, 0), (rows, colsz, c_in),
                                      (sh, sw, 1))
            cols.append(patch.reshape(TH * OW, c_in))
    patches = jnp.concatenate(cols, axis=-1)           # (TH*OW, KH*KW*Cin)

    acc = jnp.dot(patches, w_ref[...],
                  preferred_element_type=jnp.float32)  # (TH*OW, Cout_pad) f32
    acc = acc + b_ref[...]                             # broadcast (1, Cout_pad)
    o_ref[0] = acc.astype(o_ref.dtype)


def _pick_row_tile(OH, OW):
    """Largest output-row tile TH dividing OH with TH*OW ~<= 128 rows of M and
    (TH*OW) a sublane multiple (or the full image)."""
    cap = max(1, 128 // max(OW, 1))
    for th in range(min(cap, OH), 0, -1):
        if OH % th == 0 and (th * OW) % 8 == 0:
            return th
    return OH


def conv2d_pallas(x_nchw, weight_oihw, bias, *, stride=1, padding=0,
                  dilation=1, groups=1):
    """Forward pass equivalent to torch.nn.functional.conv2d (groups == 1)."""
    if groups != 1:
        # TODO(synk): grouped convolution not implemented in this kernel.
        raise NotImplementedError("groups != 1 not supported")

    if isinstance(stride, int):
        stride = (stride, stride)
    if isinstance(padding, int):
        padding = (padding, padding)
    if isinstance(dilation, int):
        dilation = (dilation, dilation)

    N, C_in, H, W = x_nchw.shape
    C_out, _, KH, KW = weight_oihw.shape
    ph, pw = padding
    sh, sw = stride
    dh, dw = dilation
    OH = (H + 2 * ph - dh * (KH - 1) - 1) // sh + 1
    OW = (W + 2 * pw - dw * (KW - 1) - 1) // sw + 1
    Hp, Wp = H + 2 * ph, W + 2 * pw

    K = KH * KW * C_in
    CP = ((C_out + 127) // 128) * 128          # lane-dense padded Cout

    # Boundary layout plumbing (plain JAX): NCHW->NHWC + zero pad (fused by
    # XLA into one rewrite).
    # TODO(synk): for large images, fold the spatial zero-pad and a halo'd
    # input-row tile into manual DMA (pl.ANY + make_async_copy) instead of a
    # padded HBM copy + full-image VMEM block.
    x = jnp.transpose(x_nchw, (0, 2, 3, 1))
    x = jnp.pad(x, ((0, 0), (ph, ph), (pw, pw), (0, 0)))        # (N, Hp, Wp, Cin)

    # OIHW -> HWIO -> (KH*KW*Cin, Cout) im2col order, zero-pad Cout to CP.
    w2d = jnp.transpose(weight_oihw, (2, 3, 1, 0)).reshape(K, C_out)
    w2d = jnp.pad(w2d, ((0, 0), (0, CP - C_out))).astype(x.dtype)
    if bias is None:
        bias = jnp.zeros((C_out,), jnp.float32)
    b = jnp.pad(bias.astype(jnp.float32), (0, CP - C_out)).reshape(1, CP)

    TH = _pick_row_tile(OH, OW)
    NT = OH // TH

    kernel = functools.partial(
        _conv2d_kernel, TH=TH, OW=OW, KH=KH, KW=KW,
        stride=(sh, sw), dilation=(dh, dw), c_in=C_in)

    out = pl.pallas_call(
        kernel,
        out_shape=jax.ShapeDtypeStruct((N, OH * OW, CP), x.dtype),
        grid_spec=pltpu.PrefetchScalarGridSpec(
            num_scalar_prefetch=0,
            grid=(N, NT),
            in_specs=[
                # Whole padded image per batch element; block index ignores the
                # row-tile axis so it is fetched once per batch element.
                pl.BlockSpec((1, Hp, Wp, C_in), lambda n, i: (n, 0, 0, 0)),
                pl.BlockSpec((K, CP), lambda n, i: (0, 0)),
                pl.BlockSpec((1, CP), lambda n, i: (0, 0)),
            ],
            out_specs=pl.BlockSpec((1, TH * OW, CP), lambda n, i: (n, i, 0)),
        ),
        compiler_params=pltpu.CompilerParams(
            dimension_semantics=("parallel", "parallel")),
    )(x, w2d, b)

    # Drop the zero-padded channels, restore NCHW.
    out = out[:, :, :C_out].reshape(N, OH, OW, C_out)
    return jnp.transpose(out, (0, 3, 1, 2))


def init_conv_params(key, in_channels, out_channels, kernel_size):
    """Deterministic init matching reset_parameters():
    kaiming_uniform_(a=sqrt(5)) -> U(-1/sqrt(fan_in), 1/sqrt(fan_in)),
    bias ~ U(-1/sqrt(fan_in), 1/sqrt(fan_in))."""
    kh, kw = kernel_size
    fan_in = in_channels * kh * kw
    bound = 1.0 / (fan_in ** 0.5)
    kw_key, kb_key = jax.random.split(key)
    weight = jax.random.uniform(kw_key, (out_channels, in_channels, kh, kw),
                                jnp.float32, -bound, bound)
    bias = jax.random.uniform(kb_key, (out_channels,), jnp.float32,
                              -bound, bound)
    return weight, bias


if __name__ == "__main__":
    key = jax.random.PRNGKey(0)
    k_x, k_p = jax.random.split(key)

    # Module config: Conv2d(in_channels=4, out_channels=8, kernel_size=3,
    #                       stride=1, padding=1, bias=True, groups=1)
    N, C_in, H, W = 2, 4, 16, 16
    C_out, KH, KW = 8, 3, 3
    stride, padding, dilation, groups = 1, 1, 1, 1

    x = jax.random.normal(k_x, (N, C_in, H, W), jnp.float32)
    weight, bias = init_conv_params(k_p, C_in, C_out, (KH, KW))

    out = conv2d_pallas(x, weight, bias, stride=stride, padding=padding,
                        dilation=dilation, groups=groups)
    out = jax.block_until_ready(out)

    # Reference check against XLA's convolution (same semantics as F.conv2d).
    ref = jax.lax.conv_general_dilated(
        x, weight, window_strides=(stride, stride),
        padding=[(padding, padding), (padding, padding)],
        rhs_dilation=(dilation, dilation),
        dimension_numbers=("NCHW", "OIHW", "NCHW"),
        feature_group_count=groups,
    ) + bias[None, :, None, None]

    assert out.shape == (N, C_out, H, W), out.shape
    assert jnp.allclose(out, ref, atol=1e-4, rtol=1e-4), "mismatch vs reference"
    print("KERNEL_OK")
</pallas_src>

<mosaic_0001>
module attributes {stable_mosaic.version = 11 : i64} {
  func.func @_conv2d_kernel(%arg0: i32, %arg1: i32, %arg2: memref<1x18x18x4xf32, #tpu.memory_space<vmem>>, %arg3: memref<36x128xf32, #tpu.memory_space<vmem>>, %arg4: memref<1x128xf32, #tpu.memory_space<vmem>>, %arg5: memref<1x128x128xf32, #tpu.memory_space<vmem>>) attributes {dimension_semantics = [#tpu.dimension_semantics<parallel>, #tpu.dimension_semantics<parallel>], iteration_bounds = array<i64: 2, 2>, scalar_prefetch = 0 : i64, scratch_operands = 0 : i64, tpu.core_type = #tpu.core_type<tc>, window_params = [{transform_indices = @transform_0, window_bounds = array<i64: 1, 18, 18, 4>}, {pipeline_mode = #tpu.pipeline_mode<synchronous>, transform_indices = @transform_1, window_bounds = array<i64: 36, 128>}, {pipeline_mode = #tpu.pipeline_mode<synchronous>, transform_indices = @transform_2, window_bounds = array<i64: 1, 128>}, {transform_indices = @transform_3, window_bounds = array<i64: 1, 128, 128>}]} {
    %c8_i32 = arith.constant 8 : i32
    %0 = arith.muli %arg1, %c8_i32 : i32
    %1 = tpu.assume_multiple %0, 8 : i32
    %c0_i32 = arith.constant 0 : i32
    %2 = arith.addi %1, %c0_i32 : i32
    %c0 = arith.constant 0 : index
    %3 = arith.index_cast %2 : i32 to index
    %c0_0 = arith.constant 0 : index
    %c0_1 = arith.constant 0 : index
    %4 = vector.load %arg2[%c0, %3, %c0_0, %c0_1] : memref<1x18x18x4xf32, #tpu.memory_space<vmem>>, vector<1x8x16x4xf32>
    %5 = vector.shape_cast %4 : vector<1x8x16x4xf32> to vector<8x16x4xf32>
    %6 = vector.shape_cast %5 : vector<8x16x4xf32> to vector<128x4xf32>
    %c0_i32_2 = arith.constant 0 : i32
    %7 = arith.addi %1, %c0_i32_2 : i32
    %c0_3 = arith.constant 0 : index
    %8 = arith.index_cast %7 : i32 to index
    %c1 = arith.constant 1 : index
    %c0_4 = arith.constant 0 : index
    %9 = vector.load %arg2[%c0_3, %8, %c1, %c0_4] : memref<1x18x18x4xf32, #tpu.memory_space<vmem>>, vector<1x8x16x4xf32>
    %10 = vector.shape_cast %9 : vector<1x8x16x4xf32> to vector<8x16x4xf32>
    %11 = vector.shape_cast %10 : vector<8x16x4xf32> to vector<128x4xf32>
    %c0_i32_5 = arith.constant 0 : i32
    %12 = arith.addi %1, %c0_i32_5 : i32
    %c0_6 = arith.constant 0 : index
    %13 = arith.index_cast %12 : i32 to index
    %c2 = arith.constant 2 : index
    %c0_7 = arith.constant 0 : index
    %14 = vector.load %arg2[%c0_6, %13, %c2, %c0_7] : memref<1x18x18x4xf32, #tpu.memory_space<vmem>>, vector<1x8x16x4xf32>
    %15 = vector.shape_cast %14 : vector<1x8x16x4xf32> to vector<8x16x4xf32>
    %16 = vector.shape_cast %15 : vector<8x16x4xf32> to vector<128x4xf32>
    %c1_i32 = arith.constant 1 : i32
    %17 = arith.addi %1, %c1_i32 : i32
    %c0_8 = arith.constant 0 : index
    %18 = arith.index_cast %17 : i32 to index
    %c0_9 = arith.constant 0 : index
    %c0_10 = arith.constant 0 : index
    %19 = vector.load %arg2[%c0_8, %18, %c0_9, %c0_10] : memref<1x18x18x4xf32, #tpu.memory_space<vmem>>, vector<1x8x16x4xf32>
    %20 = vector.shape_cast %19 : vector<1x8x16x4xf32> to vector<8x16x4xf32>
    %21 = vector.shape_cast %20 : vector<8x16x4xf32> to vector<128x4xf32>
    %c1_i32_11 = arith.constant 1 : i32
    %22 = arith.addi %1, %c1_i32_11 : i32
    %c0_12 = arith.constant 0 : index
    %23 = arith.index_cast %22 : i32 to index
    %c1_13 = arith.constant 1 : index
    %c0_14 = arith.constant 0 : index
    %24 = vector.load %arg2[%c0_12, %23, %c1_13, %c0_14] : memref<1x18x18x4xf32, #tpu.memory_space<vmem>>, vector<1x8x16x4xf32>
    %25 = vector.shape_cast %24 : vector<1x8x16x4xf32> to vector<8x16x4xf32>
    %26 = vector.shape_cast %25 : vector<8x16x4xf32> to vector<128x4xf32>
    %c1_i32_15 = arith.constant 1 : i32
    %27 = arith.addi %1, %c1_i32_15 : i32
    %c0_16 = arith.constant 0 : index
    %28 = arith.index_cast %27 : i32 to index
    %c2_17 = arith.constant 2 : index
    %c0_18 = arith.constant 0 : index
    %29 = vector.load %arg2[%c0_16, %28, %c2_17, %c0_18] : memref<1x18x18x4xf32, #tpu.memory_space<vmem>>, vector<1x8x16x4xf32>
    %30 = vector.shape_cast %29 : vector<1x8x16x4xf32> to vector<8x16x4xf32>
    %31 = vector.shape_cast %30 : vector<8x16x4xf32> to vector<128x4xf32>
    %c2_i32 = arith.constant 2 : i32
    %32 = arith.addi %1, %c2_i32 : i32
    %c0_19 = arith.constant 0 : index
    %33 = arith.index_cast %32 : i32 to index
    %c0_20 = arith.constant 0 : index
    %c0_21 = arith.constant 0 : index
    %34 = vector.load %arg2[%c0_19, %33, %c0_20, %c0_21] : memref<1x18x18x4xf32, #tpu.memory_space<vmem>>, vector<1x8x16x4xf32>
    %35 = vector.shape_cast %34 : vector<1x8x16x4xf32> to vector<8x16x4xf32>
    %36 = vector.shape_cast %35 : vector<8x16x4xf32> to vector<128x4xf32>
    %c2_i32_22 = arith.constant 2 : i32
    %37 = arith.addi %1, %c2_i32_22 : i32
    %c0_23 = arith.constant 0 : index
    %38 = arith.index_cast %37 : i32 to index
    %c1_24 = arith.constant 1 : index
    %c0_25 = arith.constant 0 : index
    %39 = vector.load %arg2[%c0_23, %38, %c1_24, %c0_25] : memref<1x18x18x4xf32, #tpu.memory_space<vmem>>, vector<1x8x16x4xf32>
    %40 = vector.shape_cast %39 : vector<1x8x16x4xf32> to vector<8x16x4xf32>
    %41 = vector.shape_cast %40 : vector<8x16x4xf32> to vector<128x4xf32>
    %c2_i32_26 = arith.constant 2 : i32
    %42 = arith.addi %1, %c2_i32_26 : i32
    %c0_27 = arith.constant 0 : index
    %43 = arith.index_cast %42 : i32 to index
    %c2_28 = arith.constant 2 : index
    %c0_29 = arith.constant 0 : index
    %44 = vector.load %arg2[%c0_27, %43, %c2_28, %c0_29] : memref<1x18x18x4xf32, #tpu.memory_space<vmem>>, vector<1x8x16x4xf32>
    %45 = vector.shape_cast %44 : vector<1x8x16x4xf32> to vector<8x16x4xf32>
    %46 = vector.shape_cast %45 : vector<8x16x4xf32> to vector<128x4xf32>
    %47 = tpu.concatenate %6, %11, %16, %21, %26, %31, %36, %41, %46 in 1 : vector<128x4xf32>, vector<128x4xf32>, vector<128x4xf32>, vector<128x4xf32>, vector<128x4xf32>, vector<128x4xf32>, vector<128x4xf32>, vector<128x4xf32>, vector<128x4xf32> -> vector<128x36xf32>
    %c0_30 = arith.constant 0 : index
    %c0_31 = arith.constant 0 : index
    %48 = vector.load %arg3[%c0_30, %c0_31] : memref<36x128xf32, #tpu.memory_space<vmem>>, vector<36x128xf32>
    %cst = arith.constant dense<0.000000e+00> : vector<128x128xf32>
    %49 = tpu.matmul %47, %48, %cst {dimension_numbers = #tpu.dot_dimension_numbers<[1], [0], [0], [1], [0, 0, 1, 1], [], []>} : vector<128x36xf32>, vector<36x128xf32>, vector<128x128xf32> -> vector<128x128xf32>
    %c0_32 = arith.constant 0 : index
    %c0_33 = arith.constant 0 : index
    %50 = vector.load %arg4[%c0_32, %c0_33] : memref<1x128xf32, #tpu.memory_space<vmem>>, vector<1x128xf32>
    %51 = vector.broadcast %50 : vector<1x128xf32> to vector<128x128xf32>
    %52 = arith.addf %49, %51 : vector<128x128xf32>
    %c0_34 = arith.constant 0 : index
    %c0_35 = arith.constant 0 : index
    %c0_36 = arith.constant 0 : index
    %53 = vector.load %arg5[%c0_34, %c0_35, %c0_36] : memref<1x128x128xf32, #tpu.memory_space<vmem>>, vector<1x128x128xf32>
    %54 = vector.shape_cast %53 : vector<1x128x128xf32> to vector<128x128xf32>
    %55 = vector.shape_cast %52 : vector<128x128xf32> to vector<1x128x128xf32>
    tpu.vector_store %arg5[%c0_34, %c0_35, %c0_36], %55 {strides = array<i32>} : memref<1x128x128xf32, #tpu.memory_space<vmem>>, vector<1x128x128xf32>,
    return
  }
  func.func @transform_0(%arg0: i32, %arg1: i32) -> (i32, i32, i32, i32) {
    %c0_i32 = arith.constant 0 : i32
    %c0_i32_0 = arith.constant 0 : i32
    %c0_i32_1 = arith.constant 0 : i32
    %c0_i32_2 = arith.constant 0 : i32
    return %arg0, %c0_i32, %c0_i32_0, %c0_i32_1 : i32, i32, i32, i32
  }
  func.func @transform_1(%arg0: i32, %arg1: i32) -> (i32, i32) {
    %c0_i32 = arith.constant 0 : i32
    %c0_i32_0 = arith.constant 0 : i32
    %c0_i32_1 = arith.constant 0 : i32
    return %c0_i32, %c0_i32_0 : i32, i32
  }
  func.func @transform_2(%arg0: i32, %arg1: i32) -> (i32, i32) {
    %c0_i32 = arith.constant 0 : i32
    %c0_i32_0 = arith.constant 0 : i32
    %c0_i32_1 = arith.constant 0 : i32
    return %c0_i32, %c0_i32_0 : i32, i32
  }
  func.func @transform_3(%arg0: i32, %arg1: i32) -> (i32, i32, i32) {
    %c0_i32 = arith.constant 0 : i32
    %c0_i32_0 = arith.constant 0 : i32
    return %arg0, %arg1, %c0_i32 : i32, i32, i32
  }
}

</mosaic_0001>

<bundles_post_ra>
// kernel: tpu_custom_call.1
= control target key start
LH: loop header
LB: loop body
LE: loop exit
PB: predicated region body
PF: predicated region fallthrough
CT: control target
= control target key end

     0   :  { %8 = vsyncpa [#allocation3], 0  ;;  %s2461_s0 = inlined_call_operand.vmem [shape: f32[2,18,18,4], index: 0, kind: input, shape index: {}]   ;;  %s2462_s1 = inlined_call_operand.vmem [shape: f32[36,128], index: 1, kind: input, shape index: {}]   ;;  %s2463_s2 = inlined_call_operand.vmem [shape: f32[1,128], index: 2, kind: input, shape index: {}]   ;;  %s2464_s3 = inlined_call_operand.hbm [shape: f32[2,256,128], index: 3, kind: output, shape index: {}]  }
   0x1   :  { %10 = vsyncpa [#allocation3 + $0x1], 0  ;;  %s1722_s12 = smov 0   ;;  %s1724_s13 = smov 0  }
   0x2   :  { %s1726_s14 = smov 0   ;;  %s1728_s15 = smov 0  }
   0x3   :  { %s1730_s16 = smov 0   ;;  %s1732_s17 = smov 0  }
   0x4   :  { %s1734_s18 = smov 0   ;;  %s1736_s19 = smov 0  }
   0x5 LB: > { %s1313_s20 = sadd.s32 4294967295, %s1690_s19   ;;  %s1314_s21 = sadd.s32 4294967294, %s1690_s19   ;;  %s1690_s19 = sphi %s1736_s19, %s16_s19   ;;  %s1686_s18 = sphi %s1734_s18, %s2491_s18   ;;  %s1682_s17 = sphi %s1732_s17, %s2490_s17   ;;  %s1678_s16 = sphi %s1730_s16, %s2489_s16   ;;  %s1674_s15 = sphi %s1728_s15, %s2488_s15   ;;  %s1670_s14 = sphi %s1726_s14, %s2487_s14   ;;  %s1666_s13 = sphi %s1724_s13, %s2486_s13   ;;  %s1662_s12 = sphi %s1722_s12, %s2485_s12  }
   0x6   : > { %s25_s22 = sadd.s32 1, %s1682_s17  ;;  %s28_s23 = sadd.s32 1, %s1686_s18 }
   0x7   : > { %p26_p0 = scmp.ge.s32.totalorder %s25_s22, 2  ;;  %p115_p1 = scmp.ne.s32.totalorder %s1670_s14, %s1666_s13 }
   0x8   : > { %p116_p2 = scmp.eq.s32.totalorder %s1313_s20, 3  ;;  %p121_p5 = scmp.ne.s32.totalorder %s1666_s13, %s1662_s12 }
   0x9   : > { %s2493_s22 = smov (%p26_p0, %s25_s22), 0  ;;  %s2495_s23 = smov (!%p26_p0, %s28_s23), %s1686_s18 }
   0xa   : > { %s101_s24 = ssub.s32 %s1682_s17, %s2493_s22  ;;  %p1773_p3 = por %p116_p2, %p115_p1 }
   0xb   : > { %p30_p4 = scmp.ge.s32.totalorder %s2495_s23, 2  ;;  %p122_p6 = scmp.eq.s32.totalorder %s1314_s21, 3 }
   0xc   : > { %p1317_p7 = scmp.ge.s32.totalorder %s1690_s19, 1  ;;  %p154_p9 = scmp.lt.s32.totalorder %s1690_s19, 5 }
   0xd   : > { %s2497_s23 = smov (%p30_p4, %s2495_s23), 0  ;;  %p1782_p8 = por %p122_p6, %p121_p5 }
   0xe   : > { %s100_s27 = ssub.s32 %s1686_s18, %s2497_s23  ;;  %s105_s28 = sadd.s32 1, %s1670_s14 }
   0xf   : > { %s102_s29 = sor.u32 %s101_s24, %s100_s27  ;;  %p155_p10 = pnand %p1317_p7, %p154_p9 }
  0x10   : > { %p103_p11 = scmp.eq.s32.totalorder %s102_s29, 0 }
  0x11   : > { %158 = sbr.rel (%p155_p10) target bundleno = 631 (0x277), region = 32 }
  0x12   : > { %s1791_s30 = scalar_select %p103_p11, %s1670_s14, %s105_s28  }
  0x18   : > { %p178_p12 = scmp.lt.s32.totalorder %s1678_s16, 1  ;;  %s1321_s5 = smul.u32 192, %s1674_s15  ;;  %v985_v26 = vld [vmem:[%s2462_s1] sm:$0xff]  ;;  %v986_v27 = vld [vmem:[%s2462_s1 + $0x8] sm:$0xff]  ;;  %v987_v31 = vld [vmem:[%s2462_s1 + $0x10] sm:$0xff]  ;;  %vm1046_vm0 = vcmask 1043456  }
  0x19   : > { %s1692_s11 = smov 4   ;;  %s1693_s20 = smov 8   ;;  %v1501_v30 = vpack.c.bf16 %v986_v27, %v985_v26  ;;  %v988_v32 = vld [vmem:[%s2462_s1 + $0x18] sm:$0xff]  ;;  %v989_v36 = vld [vmem:[%s2462_s1 + $0x20] sm:$0xf]  ;;  %vm849_vm1 = vcmask 31744  }
  0x1a   : > { %s179_s4 = scalar_select %p178_p12, %s1678_s16, 1  ;;  %v1505_v35 = vpack.c.bf16 %v988_v32, %v987_v31  ;;  %vm866_vm2 = vcmask 64512   ;;  %vm883_vm3 = vcmask 97280   ;;  %vm900_vm4 = vcmask 130048  }
  0x1b   : > { %s2465_s21 = smov 12   ;;  %s1695_s24 = smov 16   ;;  %1502 = vmatprep.subr.bf16.mxu0 %v1501_v30  ;;  %1509 = vmatprep.subr.bf16.mxu1 %v1501_v30  ;;  %vm917_vm5 = vcmask 162816   ;;  %vm934_vm6 = vcmask 195584   ;;  %vm951_vm7 = vcmask 228352   ;;  %vm968_vm8 = vcmask 261120  }
  0x1c   : > { %s1515_s6 = smul.u32 432, %s179_s4  ;;  %s1696_s27 = smov 20   ;;  %1504 = vmatpush3.bf16.msra.mxu0 %v1501_v30  ;;  %1512 = vmatpush3.bf16.msra.mxu1 %v1501_v30  ;;  %vm997_vm9 = vcmask 293888  }
  0x1d   : > { %s1697_s28 = smov 24   ;;  %s1698_s29 = smov 28   ;;  %1506 = vmatprep.subr.bf16.mxu0 %v1505_v35  ;;  %1510 = vmatprep.subr.bf16.mxu1 %v1505_v35 }
  0x1e   : > { %s182_s9 = scalar_lea.vmem %s2461_s0, %s1515_s6  ;;  %s1442_s8 = sshll.u32 %s1678_s16, 5 }
  0x1f   : > { %s1799_s10 = scalar_lea.vmem %s182_s9, %s1321_s5  ;;  %s1699_s5 = smov 32  }
  0x20   : > { %v204_v0 = vld [vmem:[%s1799_s10 + $0x9] sm:$0xff]  ;;  %v203_v1 = vld [vmem:[%s1799_s10 + $0x1] sm:$0xff]  ;;  %v1830_v8 = vld [vmem:[%s1799_s10 + $0x78] sm:$0xff]  ;;  %1508 = vmatpush3.bf16.msra.mxu0 %v1505_v35  ;;  %1513 = vmatpush3.bf16.msra.mxu1 %v1505_v35 }
  0x21   : > { %355 = vrot.lane.b32.xlu1 %v204_v0, %s1692_s11  ;;  %353 = vrot.lane.b32.xlu0 %v203_v1, %s1692_s11  ;;  %v1806_v2 = vld [vmem:[%s1799_s10 + $0x69] sm:$0xff]  ;;  %v1809_v3 = vld [vmem:[%s1799_s10 + $0x61] sm:$0xff] }
  0x22   : > { %v1816_v4 = vld [vmem:[%s1799_s10 + $0x62] sm:$0xff]  ;;  %v1823_v6 = vld [vmem:[%s1799_s10 + $0x6a] sm:$0xff]  ;;  %v1833_v9 = vld [vmem:[%s1799_s10 + $0x18] sm:$0xff]  ;;  %1475 = vmatprep.subr.msk.mxu0 %vm1046_vm0, %v989_v36  ;;  %1511 = vmatprep.subr.msk.mxu1 %vm1046_vm0, %v989_v36 }
  0x23   : > { %v219_v5 = vld [vmem:[%s1799_s10 + $0x2] sm:$0xff]  ;;  %v220_v7 = vld [vmem:[%s1799_s10 + $0xa] sm:$0xff]  ;;  %v1850_v12 = vld [vmem:[%s1799_s10 + $0x79] sm:$0xff] }
  0x24   : > { %v1840_v10 = vld [vmem:[%s1799_s10 + $0x80] sm:$0xff]  ;;  %v1887_v20 = vld [vmem:[%s1799_s10 + $0x90] sm:$0xff]  ;;  %v1904_v22 = vld [vmem:[%s1799_s10 + $0x98] sm:$0xff]  ;;  %1476 = vmatpush3.msk.msra.mxu0 %vm1046_vm0, %v989_v36  ;;  %1514 = vmatpush3.msk.msra.mxu1 %vm1046_vm0, %v989_v36 }
  0x25   : > { %371 = vrot.lane.b32.xlu1 %v1806_v2, %s1692_s11  ;;  %369 = vrot.lane.b32.xlu0 %v1809_v3, %s1692_s11  ;;  %v1843_v11 = vld [vmem:[%s1799_s10 + $0x20] sm:$0xff]  ;;  %v1890_v21 = vld [vmem:[%s1799_s10 + $0x30] sm:$0xff] }
  0x26   : > { %v1340_v13 = vld [vmem:[%s1799_s10 + $0x19] sm:$0xff]  ;;  %v1860_v14 = vld [vmem:[%s1799_s10 + $0x81] sm:$0xff]  ;;  %v1398_v24 = vld [vmem:[%s1799_s10 + $0x91] sm:$0xff] }
  0x27   : > { %v1341_v15 = vld [vmem:[%s1799_s10 + $0x21] sm:$0xff]  ;;  %v1907_v23 = vld [vmem:[%s1799_s10 + $0x38] sm:$0xff]  ;;  %v1991_v47 = vld [vmem:[%s1799_s10 + $0xb0] sm:$0xff] }
  0x28   : > { %v1867_v16 = vld [vmem:[%s1799_s10 + $0x7a] sm:$0xff]  ;;  %v1880_v18 = vld [vmem:[%s1799_s10 + $0x82] sm:$0xff]  ;;  %v1390_v25 = vld [vmem:[%s1799_s10 + $0x31] sm:$0xff]  ;;  %2478 = vst [vmem:[#allocation8_spill] sm:$0xff] %v1991_v47 }
  0x29   : > { %433 = vrot.lane.b32.xlu1 %v1816_v4, %s1693_s20  ;;  %417 = vrot.lane.b32.xlu0 %v219_v5, %s1693_s20  ;;  %v1356_v17 = vld [vmem:[%s1799_s10 + $0x1a] sm:$0xff]  ;;  %2474 = vst [vmem:[#allocation5_spill] sm:$0xff] %v1880_v18  ;;  %v1357_v19 = vld [vmem:[%s1799_s10 + $0x22] sm:$0xff] }
  0x2a   : > { %v1399_v28 = vld [vmem:[%s1799_s10 + $0x99] sm:$0xff]  ;;  %v1963_v39 = vld [vmem:[%s1799_s10 + $0xa8] sm:$0xff]  ;;  %v1994_v48 = vld [vmem:[%s1799_s10 + $0x50] sm:$0xff] }
  0x2b   : > { %v1391_v29 = vld [vmem:[%s1799_s10 + $0x39] sm:$0xff]  ;;  %2475 = vst [vmem:[#allocation6_spill] sm:$0xff] %v1963_v39  ;;  %v1966_v40 = vld [vmem:[%s1799_s10 + $0x48] sm:$0xff]  ;;  %2479 = vst [vmem:[#allocation9_spill] sm:$0xff] %v1994_v48 }
  0x2c   : > { %v1414_v33 = vld [vmem:[%s1799_s10 + $0x92] sm:$0xff]  ;;  %v1415_v37 = vld [vmem:[%s1799_s10 + $0x9a] sm:$0xff]  ;;  %2476 = vst [vmem:[#allocation7_spill] sm:$0xff] %v1966_v40  ;;  %v1400_v51 = vld [vmem:[%s1799_s10 + $0xa9] sm:$0xff] }
  0x2d   : > { %435 = vrot.lane.b32.xlu1 %v1823_v6, %s1693_s20  ;;  %419 = vrot.lane.b32.xlu0 %v220_v7, %s1693_s20  ;;  %v1406_v34 = vld [vmem:[%s1799_s10 + $0x32] sm:$0xff]  ;;  %v1407_v38 = vld [vmem:[%s1799_s10 + $0x3a] sm:$0xff] }
  0x2e   : > { %v1392_v52 = vld [vmem:[%s1799_s10 + $0x49] sm:$0xff]  ;;  %v1401_v59 = vld [vmem:[%s1799_s10 + $0xb1] sm:$0xff]  ;;  %v1386_v35 = vld [vmem:[%s1799_s10 + $0xc0] sm:$0xff] }
  0x2f   : > { %v1393_v60 = vld [vmem:[%s1799_s10 + $0x51] sm:$0xff] }
  0x30   : > { %v1416_v63 = vld [vmem:[%s1799_s10 + $0xaa] sm:$0xff]  ;;  %v1409_v26 = vld [vmem:[%s1799_s10 + $0x52] sm:$0xff] }
  0x31   : > { %497 = vrot.lane.b32.xlu1 %v1830_v8, %s2465_s21  ;;  %481 = vrot.lane.b32.xlu0 %v1833_v9, %s2465_s21  ;;  %v1408_v0 = vld [vmem:[%s1799_s10 + $0x4a] sm:$0xff] }
  0x35   : > { %499 = vrot.lane.b32.xlu1 %v1840_v10, %s2465_s21  ;;  %483 = vrot.lane.b32.xlu0 %v1843_v11, %s2465_s21 }
  0x39   : > { %561 = vrot.lane.b32.xlu1 %v1850_v12, %s1695_s24  ;;  %545 = vrot.lane.b32.xlu0 %v1340_v13, %s1695_s24 }
  0x3d   : > { %373 = vrot.lane.b32.xlu1 %v1850_v12, %s1692_s11  ;;  %357 = vrot.lane.b32.xlu0 %v1340_v13, %s1692_s11 }
  0x41   : > { %563 = vrot.lane.b32.xlu1 %v1860_v14, %s1695_s24  ;;  %547 = vrot.lane.b32.xlu0 %v1341_v15, %s1695_s24 }
  0x45   : > { %625 = vrot.lane.b32.xlu1 %v1867_v16, %s1696_s27  ;;  %609 = vrot.lane.b32.xlu0 %v1356_v17, %s1696_s27 }
  0x49   : > { %375 = vrot.lane.b32.xlu1 %v1860_v14, %s1692_s11  ;;  %359 = vrot.lane.b32.xlu0 %v1341_v15, %s1692_s11 }
  0x4d   : > { %437 = vrot.lane.b32.xlu1 %v1867_v16, %s1693_s20  ;;  %421 = vrot.lane.b32.xlu0 %v1356_v17, %s1693_s20 }
  0x51   : > { %627 = vrot.lane.b32.xlu1 %v1880_v18, %s1696_s27  ;;  %611 = vrot.lane.b32.xlu0 %v1357_v19, %s1696_s27 }
  0x55   : > { %689 = vrot.lane.b32.xlu1 %v1887_v20, %s1697_s28  ;;  %673 = vrot.lane.b32.xlu0 %v1890_v21, %s1697_s28 }
  0x59   : > { %439 = vrot.lane.b32.xlu1 %v1880_v18, %s1693_s20  ;;  %423 = vrot.lane.b32.xlu0 %v1357_v19, %s1693_s20 }
  0x5d   : > { %501 = vrot.lane.b32.xlu1 %v1887_v20, %s2465_s21  ;;  %485 = vrot.lane.b32.xlu0 %v1890_v21, %s2465_s21 }
  0x61   : > { %691 = vrot.lane.b32.xlu1 %v1904_v22, %s1697_s28  ;;  %675 = vrot.lane.b32.xlu0 %v1907_v23, %s1697_s28 }
  0x65   : > { %753 = vrot.lane.b32.xlu1 %v1398_v24, %s1698_s29  ;;  %737 = vrot.lane.b32.xlu0 %v1390_v25, %s1698_s29 }
  0x69   : > { %503 = vrot.lane.b32.xlu1 %v1904_v22, %s2465_s21  ;;  %487 = vrot.lane.b32.xlu0 %v1907_v23, %s2465_s21  ;;  %s2477_s21 = smov 12  }
  0x6d   : > { %565 = vrot.lane.b32.xlu1 %v1398_v24, %s1695_s24  ;;  %549 = vrot.lane.b32.xlu0 %v1390_v25, %s1695_s24 }
  0x71   : > { %755 = vrot.lane.b32.xlu1 %v1399_v28, %s1698_s29  ;;  %739 = vrot.lane.b32.xlu0 %v1391_v29, %s1698_s29 }
  0x75   : > { %817 = vrot.lane.b32.xlu1 %v1414_v33, %s1699_s5  ;;  %801 = vrot.lane.b32.xlu0 %v1406_v34, %s1699_s5 }
  0x79   : > { %377 = vrot.lane.b32.xlu1 %v1398_v24, %s1692_s11  ;;  %361 = vrot.lane.b32.xlu0 %v1390_v25, %s1692_s11  ;;  %v1417_v25 = vld [vmem:[%s1799_s10 + $0xb2] sm:$0xff] }
  0x7d   : > { %567 = vrot.lane.b32.xlu1 %v1399_v28, %s1695_s24  ;;  %551 = vrot.lane.b32.xlu0 %v1391_v29, %s1695_s24 }
  0x81   : > { %629 = vrot.lane.b32.xlu1 %v1414_v33, %s1696_s27  ;;  %613 = vrot.lane.b32.xlu0 %v1406_v34, %s1696_s27 }
  0x85   : > { %819 = vrot.lane.b32.xlu1 %v1415_v37, %s1699_s5  ;;  %803 = vrot.lane.b32.xlu0 %v1407_v38, %s1699_s5 }
  0x89   : > { %379 = vrot.lane.b32.xlu1 %v1399_v28, %s1692_s11  ;;  %363 = vrot.lane.b32.xlu0 %v1391_v29, %s1692_s11 }
  0x8d   : > { %441 = vrot.lane.b32.xlu1 %v1414_v33, %s1693_s20  ;;  %425 = vrot.lane.b32.xlu0 %v1406_v34, %s1693_s20 }
  0x91   : > { %631 = vrot.lane.b32.xlu1 %v1415_v37, %s1696_s27  ;;  %615 = vrot.lane.b32.xlu0 %v1407_v38, %s1696_s27 }
  0x93   : > { %v1968_v41 = vpop.permute.xlu1 %355  ;;  %v1970_v42 = vpop.permute.xlu0 %353 }
  0x95   : > { %693 = vrot.lane.b32.xlu1 %v1963_v39, %s1697_s28  ;;  %677 = vrot.lane.b32.xlu0 %v1966_v40, %s1697_s28 }
  0x97   : > { %v1976_v43 = vpop.permute.xlu1 %371  ;;  %v1978_v44 = vpop.permute.xlu0 %369 }
  0x99   : > { %443 = vrot.lane.b32.xlu1 %v1415_v37, %s1693_s20  ;;  %427 = vrot.lane.b32.xlu0 %v1407_v38, %s1693_s20  ;;  %v195_v38 = vld [vmem:[%s1799_s10 + $0x60] sm:$0xff] }
  0x9b   : > { %v1982_v45 = vpop.permute.xlu1 %433  ;;  %v1984_v46 = vpop.permute.xlu0 %417 }
  0x9d   : > { %505 = vrot.lane.b32.xlu1 %v1963_v39, %s2477_s21  ;;  %489 = vrot.lane.b32.xlu0 %v1966_v40, %s2477_s21 }
  0x9f   : > { %v1996_v49 = vpop.permute.xlu1 %435  ;;  %v1998_v50 = vpop.permute.xlu0 %419 }
  0xa1   : > { %695 = vrot.lane.b32.xlu1 %v1991_v47, %s1697_s28  ;;  %679 = vrot.lane.b32.xlu0 %v1994_v48, %s1697_s28 }
  0xa3   : > { %v2006_v53 = vpop.permute.xlu1 %497  ;;  %v2008_v54 = vpop.permute.xlu0 %481 }
  0xa5   : > { %757 = vrot.lane.b32.xlu1 %v1400_v51, %s1698_s29  ;;  %741 = vrot.lane.b32.xlu0 %v1392_v52, %s1698_s29 }
  0xa7   : > { %v2012_v55 = vpop.permute.xlu1 %499  ;;  %v2014_v56 = vpop.permute.xlu0 %483 }
  0xa9   : > { %507 = vrot.lane.b32.xlu1 %v1991_v47, %s2477_s21  ;;  %491 = vrot.lane.b32.xlu0 %v1994_v48, %s2477_s21  ;;  %v1387_v47 = vld [vmem:[%s1799_s10 + $0xc8] sm:$0xff] }
  0xab   : > { %v2020_v57 = vpop.permute.xlu1 %561  ;;  %v2022_v58 = vpop.permute.xlu0 %545 }
  0xad   : > { %569 = vrot.lane.b32.xlu1 %v1400_v51, %s1695_s24  ;;  %553 = vrot.lane.b32.xlu0 %v1392_v52, %s1695_s24 }
  0xaf   : > { %v374_v61 = vpop.permute.xlu1 %373  ;;  %v358_v62 = vpop.permute.xlu0 %357 }
  0xb1   : > { %759 = vrot.lane.b32.xlu1 %v1401_v59, %s1698_s29  ;;  %743 = vrot.lane.b32.xlu0 %v1393_v60, %s1698_s29 }
  0xb3   : > { %v2032_v1 = vpop.permute.xlu1 %563  ;;  %v2034_v5 = vpop.permute.xlu0 %547 }
  0xb5   : > { %821 = vrot.lane.b32.xlu1 %v1416_v63, %s1699_s5  ;;  %805 = vrot.lane.b32.xlu0 %v1408_v0, %s1699_s5 }
  0xb7   : > { %v2038_v7 = vpop.permute.xlu1 %625  ;;  %v2040_v13 = vpop.permute.xlu0 %609 }
  0xb9   : > { %381 = vrot.lane.b32.xlu1 %v1400_v51, %s1692_s11  ;;  %365 = vrot.lane.b32.xlu0 %v1392_v52, %s1692_s11 }
  0xbb   : > { %v2044_v15 = vpop.permute.xlu1 %375  ;;  %v2046_v17 = vpop.permute.xlu0 %359 }
  0xbd   : > { %571 = vrot.lane.b32.xlu1 %v1401_v59, %s1695_s24  ;;  %555 = vrot.lane.b32.xlu0 %v1393_v60, %s1695_s24 }
  0xbf   : > { %v438_v19 = vpop.permute.xlu1 %437  ;;  %v422_v24 = vpop.permute.xlu0 %421 }
  0xc1   : > { %633 = vrot.lane.b32.xlu1 %v1416_v63, %s1696_s27  ;;  %617 = vrot.lane.b32.xlu0 %v1408_v0, %s1696_s27 }
  0xc3   : > { %v2054_v27 = vpop.permute.xlu1 %627  ;;  %v2056_v28 = vpop.permute.xlu0 %611 }
  0xc5   : > { %823 = vrot.lane.b32.xlu1 %v1417_v25, %s1699_s5  ;;  %807 = vrot.lane.b32.xlu0 %v1409_v26, %s1699_s5 }
  0xc7   : > { %v2060_v29 = vpop.permute.xlu1 %689  ;;  %v2062_v30 = vpop.permute.xlu0 %673 }
  0xc9   : > { %383 = vrot.lane.b32.xlu1 %v1401_v59, %s1692_s11  ;;  %367 = vrot.lane.b32.xlu0 %v1393_v60, %s1692_s11 }
  0xcb   : > { %v2066_v31 = vpop.permute.xlu1 %439  ;;  %v2068_v32 = vpop.permute.xlu0 %423 }
  0xcd   : > { %445 = vrot.lane.b32.xlu1 %v1416_v63, %s1693_s20  ;;  %429 = vrot.lane.b32.xlu0 %v1408_v0, %s1693_s20  ;;  %v860_v63 = vsel %vm849_vm1, %v1830_v8, %v374_v61  ;;  %v852_v0 = vsel %vm849_vm1, %v1833_v9, %v358_v62  ;;  %v196_v9 = vld [vmem:[%s1799_s10 + $0x68] sm:$0xff] }
  0xce   : > { %v869_v48 = vsel %vm866_vm2, %v852_v0, %v422_v24  ;;  %v858_v24 = vsel %vm849_vm1, %v195_v38, %v1978_v44 }
  0xcf   : > { %v502_v33 = vpop.permute.xlu1 %501  ;;  %v486_v34 = vpop.permute.xlu0 %485 }
  0xd0   : > { %v886_v61 = vsel %vm883_vm3, %v869_v48, %v486_v34  ;;  %v875_v48 = vsel %vm866_vm2, %v858_v24, %v1982_v45 }
  0xd1   : > { %635 = vrot.lane.b32.xlu1 %v1417_v25, %s1696_s27  ;;  %619 = vrot.lane.b32.xlu0 %v1409_v26, %s1696_s27 }
  0xd3   : > { %v2075_v36 = vpop.permute.xlu1 %691  ;;  %v2077_v37 = vpop.permute.xlu0 %675 }
  0xd5   : > { %697 = vrot.lane.b32.xlu1 %v1386_v35, %s1697_s28  ;;  %681 = vrot.lane.b32.xlu0 %v195_v38, %s1697_s28 }
  0xd7   : > { %v754_v51 = vpop.permute.xlu1 %753  ;;  %v738_v52 = vpop.permute.xlu0 %737 }
  0xd9   : > { %447 = vrot.lane.b32.xlu1 %v1417_v25, %s1693_s20  ;;  %431 = vrot.lane.b32.xlu0 %v1409_v26, %s1693_s20  ;;  %v187_v25 = vld [vmem:[%s1799_s10] sm:$0xff]  ;;  %v877_v26 = vsel %vm866_vm2, %v860_v63, %v438_v19 }
  0xda   : > { %v894_v40 = vsel %vm883_vm3, %v877_v26, %v502_v33  ;;  %v850_v19 = vsel %vm849_vm1, %v187_v25, %v1970_v42 }
  0xdb   : > { %v2084_v59 = vpop.permute.xlu1 %503  ;;  %v2086_v60 = vpop.permute.xlu0 %487 }
  0xdd   : > { %509 = vrot.lane.b32.xlu1 %v1386_v35, %s2477_s21  ;;  %493 = vrot.lane.b32.xlu0 %v195_v38, %s2477_s21 }
  0xdf   : > { %v566_v39 = vpop.permute.xlu1 %565  ;;  %v550_v18 = vpop.permute.xlu0 %549 }
  0xe0   : > { %v2102_v62 = vsel %vm900_vm4, %v894_v40, %v566_v39  ;;  %v2105_v35 = vsel %vm900_vm4, %v886_v61, %v550_v18  ;;  %v867_v39 = vsel %vm866_vm2, %v850_v19, %v1984_v46  ;;  %v1402_v40 = vld [vmem:[%s1799_s10 + $0xc1] sm:$0xff]  ;;  %v892_v18 = vsel %vm883_vm3, %v875_v48, %v2006_v53  ;;  %v1403_v61 = vld [vmem:[%s1799_s10 + $0xc9] sm:$0xff] }
  0xe1   : > { %699 = vrot.lane.b32.xlu1 %v1387_v47, %s1697_s28  ;;  %683 = vrot.lane.b32.xlu0 %v196_v9, %s1697_s28  ;;  %v884_v42 = vsel %vm883_vm3, %v867_v39, %v2008_v54  ;;  %v909_v34 = vsel %vm900_vm4, %v892_v18, %v2020_v57  ;;  %v1418_v48 = vld [vmem:[%s1799_s10 + $0xc2] sm:$0xff] }
  0xe2   : > { %v901_v45 = vsel %vm900_vm4, %v884_v42, %v2022_v58  ;;  %v926_v46 = vsel %vm917_vm5, %v909_v34, %v2038_v7 }
  0xe3   : > { %v756_v44 = vpop.permute.xlu1 %755  ;;  %v740_v33 = vpop.permute.xlu0 %739  ;;  %v918_v38 = vsel %vm917_vm5, %v901_v45, %v2040_v13  ;;  %v943_v53 = vsel %vm934_vm6, %v926_v46, %v2060_v29 }
  0xe4   : > { %v935_v54 = vsel %vm934_vm6, %v918_v38, %v2062_v30  ;;  %v960_v57 = vsel %vm951_vm7, %v943_v53, %v754_v51  ;;  %v861_v51 = vsel %vm849_vm1, %v1840_v10, %v2044_v15 }
  0xe5   : > { %761 = vrot.lane.b32.xlu1 %v1402_v40, %s1698_s29  ;;  %745 = vrot.lane.b32.xlu0 %v1809_v3, %s1698_s29  ;;  %v952_v58 = vsel %vm951_vm7, %v935_v54, %v738_v52  ;;  %v853_v52 = vsel %vm849_vm1, %v1843_v11, %v2046_v17  ;;  %v878_v25 = vsel %vm866_vm2, %v861_v51, %v2066_v31 }
  0xe6   : > { %v870_v26 = vsel %vm866_vm2, %v853_v52, %v2068_v32  ;;  %v895_v15 = vsel %vm883_vm3, %v878_v25, %v2084_v59  ;;  %v859_v32 = vsel %vm849_vm1, %v196_v9, %v1976_v43  ;;  %v1405_v52 = vld [vmem:[%s1799_s10 + $0xe1] sm:$0xff] }
  0xe7   : > { %v818_v7 = vpop.permute.xlu1 %817  ;;  %v802_v63 = vpop.permute.xlu0 %801  ;;  %v887_v11 = vsel %vm883_vm3, %v870_v26, %v2086_v60  ;;  %v876_v59 = vsel %vm866_vm2, %v859_v32, %v1996_v49 }
  0xe8   : > { %v969_v13 = vsel %vm968_vm8, %v952_v58, %v802_v63  ;;  %v977_v0 = vsel %vm968_vm8, %v960_v57, %v818_v7  ;;  %v893_v39 = vsel %vm883_vm3, %v876_v59, %v2012_v55  ;;  %v1389_v58 = vld [vmem:[%s1799_s10 + $0xe0] sm:$0xff] }
  0xe9   : > { %511 = vrot.lane.b32.xlu1 %v1387_v47, %s2477_s21  ;;  %495 = vrot.lane.b32.xlu0 %v196_v9, %s2477_s21  ;;  %v188_v47 = vld [vmem:[%s1799_s10 + $0x8] sm:$0xff]  ;;  %v910_v9 = vsel %vm900_vm4, %v893_v39, %v2032_v1 }
  0xea   : > { %1477 = vmatprep.mubr.msk.f32.mxu0 %vm997_vm9, %v969_v13  ;;  %1489 = vmatprep.mubr.msk.f32.mxu1 %vm997_vm9, %v977_v0  ;;  %v851_v31 = vsel %vm849_vm1, %v188_v47, %v1968_v41 }
  0xeb   : > { %v378_v29 = vpop.permute.xlu1 %377  ;;  %v362_v30 = vpop.permute.xlu0 %361  ;;  %v868_v60 = vsel %vm866_vm2, %v851_v31, %v1998_v50  ;;  %v927_v50 = vsel %vm917_vm5, %v910_v9, %v2054_v27  ;;  %v2480_v31 = vld [vmem:[#allocation5_spill] sm:$0xff] }
  0xec   : > { %v885_v41 = vsel %vm883_vm3, %v868_v60, %v2014_v56  ;;  %v944_v55 = vsel %vm934_vm6, %v927_v50, %v2075_v36  ;;  %v854_v45 = vsel %vm849_vm1, %v1890_v21, %v362_v30 }
  0xed   : > { %573 = vrot.lane.b32.xlu1 %v1402_v40, %s1695_s24  ;;  %557 = vrot.lane.b32.xlu0 %v1809_v3, %s1695_s24  ;;  %v902_v49 = vsel %vm900_vm4, %v885_v41, %v2034_v5  ;;  %v961_v1 = vsel %vm951_vm7, %v944_v55, %v756_v44  ;;  %v1419_v44 = vld [vmem:[%s1799_s10 + $0xca] sm:$0xff] }
  0xee   : > { %v919_v18 = vsel %vm917_vm5, %v902_v49, %v2056_v28 }
  0xef   : > { %v568_v17 = vpop.permute.xlu1 %567  ;;  %v552_v19 = vpop.permute.xlu0 %551  ;;  %v936_v56 = vsel %vm934_vm6, %v919_v18, %v2077_v37 }
  0xf0   : > { %v2165_v24 = vsel %vm900_vm4, %v895_v15, %v568_v17  ;;  %v2168_v3 = vsel %vm900_vm4, %v887_v11, %v552_v19  ;;  %v953_v5 = vsel %vm951_vm7, %v936_v56, %v740_v33  ;;  %v862_v33 = vsel %vm849_vm1, %v1887_v20, %v378_v29  ;;  %v1388_v20 = vld [vmem:[%s1799_s10 + $0xd8] sm:$0xff]  ;;  %v1421_v15 = vld [vmem:[%s1799_s10 + $0xe2] sm:$0xff] }
  0xf1   : > { %763 = vrot.lane.b32.xlu1 %v1403_v61, %s1698_s29  ;;  %747 = vrot.lane.b32.xlu0 %v1806_v2, %s1698_s29 }
  0xf3   : > { %v2186_v40 = vpop.permute.xlu1 %629  ;;  %v2188_v43 = vpop.permute.xlu0 %613 }
  0xf4   : > { %v928_v39 = vsel %vm917_vm5, %v2102_v62, %v2186_v40  ;;  %v920_v41 = vsel %vm917_vm5, %v2105_v35, %v2188_v43 }
  0xf5   : > { %825 = vrot.lane.b32.xlu1 %v1418_v48, %s1699_s5  ;;  %809 = vrot.lane.b32.xlu0 %v1816_v4, %s1699_s5 }
  0xf7   : > { %v820_v27 = vpop.permute.xlu1 %819  ;;  %v804_v42 = vpop.permute.xlu0 %803 }
  0xf8   : > { %v978_v28 = vsel %vm968_vm8, %v961_v1, %v820_v27  ;;  %v970_v34 = vsel %vm968_vm8, %v953_v5, %v804_v42 }
  0xf9   : > { %575 = vrot.lane.b32.xlu1 %v1403_v61, %s1695_s24  ;;  %559 = vrot.lane.b32.xlu0 %v1806_v2, %s1695_s24 }
  0xfa   : > { %1478 = vmatmul.mubr.msk.f32.vlgmr.msra.gmra.mrb[0].mxu0 %vm997_vm9, %v970_v34  ;;  %1490 = vmatmul.mubr.msk.f32.vlgmr.msra.gmra.mrb[0].mxu1 %vm997_vm9, %v978_v28 }
  0xfb   : > { %v380_v36 = vpop.permute.xlu1 %379  ;;  %v364_v37 = vpop.permute.xlu0 %363 }
  0xfc   : > { %v863_v7 = vsel %vm849_vm1, %v1904_v22, %v380_v36  ;;  %v855_v63 = vsel %vm849_vm1, %v1907_v23, %v364_v37 }
  0xfd   : > { %637 = vrot.lane.b32.xlu1 %v1418_v48, %s1696_s27  ;;  %621 = vrot.lane.b32.xlu0 %v1816_v4, %s1696_s27 }
  0xff   : > { %v442_v2 = vpop.permute.xlu1 %441  ;;  %v426_v46 = vpop.permute.xlu0 %425 }
 0x100   : > { %v879_v38 = vsel %vm866_vm2, %v862_v33, %v442_v2  ;;  %v871_v53 = vsel %vm866_vm2, %v854_v45, %v426_v46 }
 0x101   : > { %827 = vrot.lane.b32.xlu1 %v1419_v44, %s1699_s5  ;;  %811 = vrot.lane.b32.xlu0 %v1823_v6, %s1699_s5 }
 0x103   : > { %v2227_v4 = vpop.permute.xlu1 %631  ;;  %v2229_v54 = vpop.permute.xlu0 %615 }
 0x104   : > { %v929_v36 = vsel %vm917_vm5, %v2165_v24, %v2227_v4  ;;  %v921_v37 = vsel %vm917_vm5, %v2168_v3, %v2229_v54  ;;  %v2481_v4 = vld [vmem:[#allocation6_spill] sm:$0xff] }
 0x105   : > { %639 = vrot.lane.b32.xlu1 %v1419_v44, %s1696_s27  ;;  %623 = vrot.lane.b32.xlu0 %v1823_v6, %s1696_s27 }
 0x107   : > { %v694_v21 = vpop.permute.xlu1 %693  ;;  %v678_v57 = vpop.permute.xlu0 %677 }
 0x108   : > { %v945_v9 = vsel %vm934_vm6, %v928_v39, %v694_v21  ;;  %v937_v49 = vsel %vm934_vm6, %v920_v41, %v678_v57  ;;  %v2482_v21 = vld [vmem:[#allocation7_spill] sm:$0xff] }
 0x109   : > { %701 = vrot.lane.b32.xlu1 %v1388_v20, %s1697_s28  ;;  %685 = vrot.lane.b32.xlu0 %v1830_v8, %s1697_s28  ;;  %v1404_v8 = vld [vmem:[%s1799_s10 + $0xd9] sm:$0xff] }
 0x10b   : > { %v444_v13 = vpop.permute.xlu1 %443  ;;  %v428_v0 = vpop.permute.xlu0 %427 }
 0x10c   : > { %v880_v6 = vsel %vm866_vm2, %v863_v7, %v444_v13  ;;  %v872_v29 = vsel %vm866_vm2, %v855_v63, %v428_v0 }
 0x10d   : > { %703 = vrot.lane.b32.xlu1 %v1389_v58, %s1697_s28  ;;  %687 = vrot.lane.b32.xlu0 %v1840_v10, %s1697_s28  ;;  %v1420_v10 = vld [vmem:[%s1799_s10 + $0xda] sm:$0xff]  ;;  %s175_s10 = sand.u32 1, %s1666_s13  }
 0x10e   : > { %s1318_s11 = sshll.u32 %s175_s10, 7 }
 0x10f   : > { %v506_v30 = vpop.permute.xlu1 %505  ;;  %v490_v51 = vpop.permute.xlu0 %489  ;;  %s2378_s28 = scalar_lea.vmem [#allocation2], %s1318_s11  ;;  %s1700_s11 = smov [#allocation2]  }
 0x110   : > { %v896_v22 = vsel %vm883_vm3, %v879_v38, %v506_v30  ;;  %v888_v23 = vsel %vm883_vm3, %v871_v53, %v490_v51  ;;  %s1600_s24 = sshll.u32 %s1700_s11, 4  ;;  %s1601_s24 = int_to_ptr.vmem [resolvable:$false] %s1600_s24 }
 0x111   : > { %765 = vrot.lane.b32.xlu1 %v1404_v8, %s1698_s29  ;;  %749 = vrot.lane.b32.xlu0 %v1850_v12, %s1698_s29  ;;  %s1602_s27 = scalar_lea.vmem %s1601_s24, 4096 }
 0x113   : > { %v696_v47 = vpop.permute.xlu1 %695  ;;  %v680_v25 = vpop.permute.xlu0 %679 }
 0x114   : > { %v946_v44 = vsel %vm934_vm6, %v929_v36, %v696_v47  ;;  %v938_v33 = vsel %vm934_vm6, %v921_v37, %v680_v25 }
 0x115   : > { %767 = vrot.lane.b32.xlu1 %v1405_v52, %s1698_s29  ;;  %751 = vrot.lane.b32.xlu0 %v1860_v14, %s1698_s29  ;;  %s1441_s29 = sshll.u32 %s1674_s15, 4  ;;  %s2408_s15 = scalar_lea.sflag [#allocation3], %s175_s10 }
 0x116   : > { %s1224_s9 = sadd.s32 %s1442_s8, %s1441_s29 }
 0x117   : > { %v758_v26 = vpop.permute.xlu1 %757  ;;  %v742_v61 = vpop.permute.xlu0 %741  ;;  %s1443_s4 = sshll.u32 %s1224_s9, 7 }
 0x118   : > { %v962_v50 = vsel %vm951_vm7, %v945_v9, %v758_v26  ;;  %v954_v18 = vsel %vm951_vm7, %v937_v49, %v742_v61  ;;  %s2398_s21 = scalar_lea.hbm %s2464_s3, %s1443_s4 }
 0x119   : > { %829 = vrot.lane.b32.xlu1 %v1420_v10, %s1699_s5  ;;  %813 = vrot.lane.b32.xlu0 %v1867_v16, %s1699_s5 }
 0x11b   : > { %v508_v11 = vpop.permute.xlu1 %507  ;;  %v492_v17 = vpop.permute.xlu0 %491 }
 0x11c   : > { %v897_v12 = vsel %vm883_vm3, %v880_v6, %v508_v11  ;;  %v889_v19 = vsel %vm883_vm3, %v872_v29, %v492_v17 }
 0x11d   : > { %831 = vrot.lane.b32.xlu1 %v1421_v15, %s1699_s5  ;;  %815 = vrot.lane.b32.xlu0 %v2480_v31, %s1699_s5  ;;  %s1227_s5 = sshll.u32 %s2378_s28, 4  ;;  %s2400_s5 = int_to_ptr.vmem [resolvable:$true] %s1227_s5 }
 0x11e   : > { %s1596_s16 = scalar_lea.vmem %s2400_s5, 2048  ;;  %p1603_p2 = scmp.lt.s32.totalorder %s2400_s5, %s1601_s24 }
 0x11f   : > { %v570_v14 = vpop.permute.xlu1 %569  ;;  %v554_v32 = vpop.permute.xlu0 %553  ;;  %p1597_p13 = scmp.ne.s32.totalorder %s2400_s5, %s1596_s16  ;;  %p1604_p4 = scmp.lt.s32.totalorder %s1602_s27, %s1596_s16 }
 0x120   : > { %v2269_v59 = vsel %vm900_vm4, %v896_v22, %v570_v14  ;;  %v2272_v60 = vsel %vm900_vm4, %v888_v23, %v554_v32 }
 0x121   : > { %p1598_p0 = pnand %p1597_p13, %p1773_p3  ;;  %p1605_p5 = por %p1604_p4, %p1603_p2 }
 0x123   : > { %v760_v16 = vpop.permute.xlu1 %759  ;;  %v744_v48 = vpop.permute.xlu0 %743  ;;  %p1599_p1 = pneg %p1598_p0 }
 0x124   : > { %v963_v45 = vsel %vm951_vm7, %v946_v44, %v760_v16  ;;  %v955_v2 = vsel %vm951_vm7, %v938_v33, %v744_v48 }
 0x125   : > { %p1606_p6 = pnand %p1605_p5, %p1599_p1 }
 0x127   : > { %v822_v55 = vpop.permute.xlu1 %821  ;;  %v806_v56 = vpop.permute.xlu0 %805 }
 0x128   : > { %v979_v1 = vsel %vm968_vm8, %v962_v50, %v822_v55  ;;  %v971_v5 = vsel %vm968_vm8, %v954_v18, %v806_v56 }
 0x129   : > { %1480 = vmatprep.mubr.msk.f32.mxu0 %vm997_vm9, %v971_v5  ;;  %1492 = vmatprep.mubr.msk.f32.mxu1 %vm997_vm9, %v979_v1 }
 0x12b   : > { %v382_v62 = vpop.permute.xlu1 %381  ;;  %v366_v35 = vpop.permute.xlu0 %365 }
 0x12c   : > { %v864_v54 = vsel %vm849_vm1, %v2481_v4, %v382_v62  ;;  %v856_v57 = vsel %vm849_vm1, %v2482_v21, %v366_v35  ;;  %v2483_v21 = vld [vmem:[#allocation8_spill] sm:$0xff] }
 0x12f   : > { %v572_v40 = vpop.permute.xlu1 %571  ;;  %v556_v43 = vpop.permute.xlu0 %555 }
 0x130   : > { %v914_v27 = vsel %vm900_vm4, %v897_v12, %v572_v40  ;;  %v906_v42 = vsel %vm900_vm4, %v889_v19, %v556_v43 }
 0x133   : > { %v634_v28 = vpop.permute.xlu1 %633  ;;  %v618_v34 = vpop.permute.xlu0 %617 }
 0x134   : > { %v930_v19 = vsel %vm917_vm5, %v2269_v59, %v634_v28  ;;  %v922_v31 = vsel %vm917_vm5, %v2272_v60, %v618_v34 }
 0x137   : > { %v824_v46 = vpop.permute.xlu1 %823  ;;  %v808_v38 = vpop.permute.xlu0 %807 }
 0x138   : > { %v980_v53 = vsel %vm968_vm8, %v963_v45, %v824_v46  ;;  %v972_v20 = vsel %vm968_vm8, %v955_v2, %v808_v38 }
 0x139   : > { %1481 = vmatmul.mubr.msk.f32.gmra.mrb[2].mxu0 %vm997_vm9, %v972_v20  ;;  %1493 = vmatmul.mubr.msk.f32.gmra.mrb[2].mxu1 %vm997_vm9, %v980_v53 }
 0x13b   : > { %v2304_v24 = vpop.permute.xlu1 %383  ;;  %v2306_v3 = vpop.permute.xlu0 %367 }
 0x13f   : > { %v446_v58 = vpop.permute.xlu1 %445  ;;  %v430_v7 = vpop.permute.xlu0 %429 }
 0x140   : > { %v881_v63 = vsel %vm866_vm2, %v864_v54, %v446_v58  ;;  %v873_v13 = vsel %vm866_vm2, %v856_v57, %v430_v7  ;;  %v865_v57 = vsel %vm849_vm1, %v2483_v21, %v2304_v24  ;;  %v2484_v58 = vld [vmem:[#allocation9_spill] sm:$0xff] }
 0x141   : > { %v857_v7 = vsel %vm849_vm1, %v2484_v58, %v2306_v3 }
 0x143   : > { %v636_v0 = vpop.permute.xlu1 %635  ;;  %v620_v6 = vpop.permute.xlu0 %619 }
 0x144   : > { %v931_v55 = vsel %vm917_vm5, %v914_v27, %v636_v0  ;;  %v923_v56 = vsel %vm917_vm5, %v906_v42, %v620_v6 }
 0x147   : > { %v698_v29 = vpop.permute.xlu1 %697  ;;  %v682_v8 = vpop.permute.xlu0 %681 }
 0x148   : > { %v947_v14 = vsel %vm934_vm6, %v930_v19, %v698_v29  ;;  %v939_v32 = vsel %vm934_vm6, %v922_v31, %v682_v8 }
 0x14b   : > { %v448_v30 = vpop.permute.xlu1 %447  ;;  %v432_v51 = vpop.permute.xlu0 %431 }
 0x14c   : > { %v874_v6 = vsel %vm866_vm2, %v857_v7, %v432_v51 }
 0x14f   : > { %v510_v22 = vpop.permute.xlu1 %509  ;;  %v494_v23 = vpop.permute.xlu0 %493 }
 0x150   : > { %v898_v46 = vsel %vm883_vm3, %v881_v63, %v510_v22  ;;  %v890_v38 = vsel %vm883_vm3, %v873_v13, %v494_v23  ;;  %v882_v13 = vsel %vm866_vm2, %v865_v57, %v448_v30 }
 0x153   : > { %v700_v52 = vpop.permute.xlu1 %699  ;;  %v684_v47 = vpop.permute.xlu0 %683 }
 0x154   : > { %v948_v1 = vsel %vm934_vm6, %v931_v55, %v700_v52  ;;  %v940_v5 = vsel %vm934_vm6, %v923_v56, %v684_v47 }
 0x157   : > { %v762_v25 = vpop.permute.xlu1 %761  ;;  %v746_v10 = vpop.permute.xlu0 %745 }
 0x158   : > { %v964_v16 = vsel %vm951_vm7, %v947_v14, %v762_v25  ;;  %v956_v48 = vsel %vm951_vm7, %v939_v32, %v746_v10 }
 0x15b   : > { %v512_v26 = vpop.permute.xlu1 %511  ;;  %v496_v61 = vpop.permute.xlu0 %495 }
 0x15c   : > { %v899_v22 = vsel %vm883_vm3, %v882_v13, %v512_v26  ;;  %v891_v24 = vsel %vm883_vm3, %v874_v6, %v496_v61 }
 0x15f   : > { %v574_v15 = vpop.permute.xlu1 %573  ;;  %v558_v11 = vpop.permute.xlu0 %557 }
 0x160   : > { %v915_v4 = vsel %vm900_vm4, %v898_v46, %v574_v15  ;;  %v907_v54 = vsel %vm900_vm4, %v890_v38, %v558_v11 }
 0x163   : > { %v764_v17 = vpop.permute.xlu1 %763  ;;  %v748_v12 = vpop.permute.xlu0 %747 }
 0x164   : > { %v965_v62 = vsel %vm951_vm7, %v948_v1, %v764_v17  ;;  %v957_v35 = vsel %vm951_vm7, %v940_v5, %v748_v12 }
 0x167   : > { %v826_v39 = vpop.permute.xlu1 %825  ;;  %v810_v41 = vpop.permute.xlu0 %809 }
 0x168   : > { %v981_v9 = vsel %vm968_vm8, %v964_v16, %v826_v39  ;;  %v973_v49 = vsel %vm968_vm8, %v956_v48, %v810_v41  ;;  %v1422_v16 = vld [vmem:[%s2463_s2] ss:$0 sm:$0xff] }
 0x169   : > { %1483 = vmatprep.mubr.msk.f32.mxu0 %vm997_vm9, %v973_v49  ;;  %1495 = vmatprep.mubr.msk.f32.mxu1 %vm997_vm9, %v981_v9 }
 0x16b   : > { %v576_v59 = vpop.permute.xlu1 %575  ;;  %v560_v60 = vpop.permute.xlu0 %559 }
 0x16c   : > { %v916_v25 = vsel %vm900_vm4, %v899_v22, %v576_v59  ;;  %v908_v30 = vsel %vm900_vm4, %v891_v24, %v560_v60 }
 0x16f   : > { %v638_v50 = vpop.permute.xlu1 %637  ;;  %v622_v18 = vpop.permute.xlu0 %621 }
 0x170   : > { %v932_v0 = vsel %vm917_vm5, %v915_v4, %v638_v50  ;;  %v924_v63 = vsel %vm917_vm5, %v907_v54, %v622_v18 }
 0x173   : > { %v828_v40 = vpop.permute.xlu1 %827  ;;  %v812_v43 = vpop.permute.xlu0 %811 }
 0x174   : > { %v982_v28 = vsel %vm968_vm8, %v965_v62, %v828_v40  ;;  %v974_v34 = vsel %vm968_vm8, %v957_v35, %v812_v43 }
 0x175   : > { %1484 = vmatmul.mubr.msk.f32.gmra.mrb[4].mxu0 %vm997_vm9, %v974_v34  ;;  %1496 = vmatmul.mubr.msk.f32.gmra.mrb[4].mxu1 %vm997_vm9, %v982_v28 }
 0x177   : > { %v640_v27 = vpop.permute.xlu1 %639  ;;  %v624_v42 = vpop.permute.xlu0 %623 }
 0x178   : > { %v933_v26 = vsel %vm917_vm5, %v916_v25, %v640_v27  ;;  %v925_v61 = vsel %vm917_vm5, %v908_v30, %v624_v42 }
 0x17b   : > { %v702_v36 = vpop.permute.xlu1 %701  ;;  %v686_v37 = vpop.permute.xlu0 %685 }
 0x17c   : > { %v949_v29 = vsel %vm934_vm6, %v932_v0, %v702_v36  ;;  %v941_v8 = vsel %vm934_vm6, %v924_v63, %v686_v37 }
 0x17f   : > { %v704_v44 = vpop.permute.xlu1 %703  ;;  %v688_v33 = vpop.permute.xlu0 %687 }
 0x180   : > { %v950_v15 = vsel %vm934_vm6, %v933_v26, %v704_v44  ;;  %v942_v11 = vsel %vm934_vm6, %v925_v61, %v688_v33 }
 0x183   : > { %v766_v45 = vpop.permute.xlu1 %765  ;;  %v750_v2 = vpop.permute.xlu0 %749 }
 0x184   : > { %v966_v23 = vsel %vm951_vm7, %v949_v29, %v766_v45  ;;  %v958_v3 = vsel %vm951_vm7, %v941_v8, %v750_v2 }
 0x187   : > { %v768_v53 = vpop.permute.xlu1 %767  ;;  %v752_v20 = vpop.permute.xlu0 %751 }
 0x188   : > { %v967_v17 = vsel %vm951_vm7, %v950_v15, %v768_v53  ;;  %v959_v12 = vsel %vm951_vm7, %v942_v11, %v752_v20 }
 0x18b   : > { %v830_v52 = vpop.permute.xlu1 %829  ;;  %v814_v47 = vpop.permute.xlu0 %813 }
 0x18c   : > { %v983_v51 = vsel %vm968_vm8, %v966_v23, %v830_v52  ;;  %v975_v10 = vsel %vm968_vm8, %v958_v3, %v814_v47 }
 0x18d   : > { %1486 = vmatprep.mubr.msk.f32.mxu0 %vm997_vm9, %v975_v10  ;;  %1498 = vmatprep.mubr.msk.f32.mxu1 %vm997_vm9, %v983_v51 }
 0x18f   : > { %v832_v19 = vpop.permute.xlu1 %831  ;;  %v816_v31 = vpop.permute.xlu0 %815 }
 0x190   : > { %v984_v14 = vsel %vm968_vm8, %v967_v17, %v832_v19  ;;  %v976_v32 = vsel %vm968_vm8, %v959_v12, %v816_v31 }
 0x191   : > { %1487 = vmatmul.mubr.msk.f32.gmra.mrb[6].mxu0 %vm997_vm9, %v976_v32  ;;  %1499 = vmatmul.mubr.msk.f32.gmra.mrb[6].mxu1 %vm997_vm9, %v984_v14 }
 0x1cd   : > { %v1479_v48 = vpop.f32.mrb[0].mxu0  ;;  %v1491_v39 = vpop.f32.mrb[0].mxu1 }
 0x1ce   : > { %v1122_v41 = vadd.f32 %v1479_v48, %v1422_v16  ;;  %v1162_v9 = vadd.f32 %v1491_v39, %v1422_v16  ;;  %v1116_v49 = vpop.f32.mrb[1].mxu0  ;;  %v1156_v59 = vpop.f32.mrb[1].mxu1 }
 0x1cf   : > { %v1117_v60 = vadd.f32 %v1422_v16, %v1116_v49  ;;  %v1157_v50 = vadd.f32 %v1422_v16, %v1156_v59 }
 0x1d0   : > { %1196 = vst [vmem:[%s2378_s28 + $0x8] sm:$0xff] %v1122_v41  ;;  %1204 = vst [vmem:[%s2378_s28 + $0x48] sm:$0xff] %v1162_v9 }
 0x1d1   : > { %1195 = vst [vmem:[%s2378_s28] sm:$0xff] %v1117_v60  ;;  %1203 = vst [vmem:[%s2378_s28 + $0x40] sm:$0xff] %v1157_v50 }
 0x20c   : > { %v1482_v18 = vpop.f32.mrb[2].mxu0  ;;  %v1494_v55 = vpop.f32.mrb[2].mxu1 }
 0x20d   : > { %v1132_v56 = vadd.f32 %v1482_v18, %v1422_v16  ;;  %v1172_v1 = vadd.f32 %v1494_v55, %v1422_v16  ;;  %v1126_v5 = vpop.f32.mrb[3].mxu0  ;;  %v1166_v62 = vpop.f32.mrb[3].mxu1 }
 0x20e   : > { %v1127_v35 = vadd.f32 %v1422_v16, %v1126_v5  ;;  %v1167_v40 = vadd.f32 %v1422_v16, %v1166_v62 }
 0x20f   : > { %1198 = vst [vmem:[%s2378_s28 + $0x18] sm:$0xff] %v1132_v56  ;;  %1206 = vst [vmem:[%s2378_s28 + $0x58] sm:$0xff] %v1172_v1 }
 0x210   : > { %1197 = vst [vmem:[%s2378_s28 + $0x10] sm:$0xff] %v1127_v35  ;;  %1205 = vst [vmem:[%s2378_s28 + $0x50] sm:$0xff] %v1167_v40 }
 0x248   : > { %v1485_v43 = vpop.f32.mrb[4].mxu0  ;;  %v1497_v28 = vpop.f32.mrb[4].mxu1 }
 0x249   : > { %v1142_v34 = vadd.f32 %v1485_v43, %v1422_v16  ;;  %v1182_v27 = vadd.f32 %v1497_v28, %v1422_v16  ;;  %v1136_v42 = vpop.f32.mrb[5].mxu0  ;;  %v1176_v36 = vpop.f32.mrb[5].mxu1 }
 0x24a   : > { %v1137_v37 = vadd.f32 %v1422_v16, %v1136_v42  ;;  %v1177_v44 = vadd.f32 %v1422_v16, %v1176_v36 }
 0x24b   : > { %1200 = vst [vmem:[%s2378_s28 + $0x28] sm:$0xff] %v1142_v34  ;;  %1208 = vst [vmem:[%s2378_s28 + $0x68] sm:$0xff] %v1182_v27 }
 0x24c   : > { %1199 = vst [vmem:[%s2378_s28 + $0x20] sm:$0xff] %v1137_v37  ;;  %1207 = vst [vmem:[%s2378_s28 + $0x60] sm:$0xff] %v1177_v44 }
 0x264   : > { %v1488_v33 = vpop.f32.mrb[6].mxu0  ;;  %v1500_v45 = vpop.f32.mrb[6].mxu1 }
 0x265   : > { %v1152_v2 = vadd.f32 %v1488_v33, %v1422_v16  ;;  %v1192_v46 = vadd.f32 %v1500_v45, %v1422_v16  ;;  %v1146_v38 = vpop.f32.mrb[7].mxu0  ;;  %v1186_v53 = vpop.f32.mrb[7].mxu1 }
 0x266   : > { %v1147_v20 = vadd.f32 %v1422_v16, %v1146_v38  ;;  %v1187_v4 = vadd.f32 %v1422_v16, %v1186_v53 }
 0x267   : > { %1202 = vst [vmem:[%s2378_s28 + $0x38] sm:$0xff] %v1152_v2  ;;  %1210 = vst [vmem:[%s2378_s28 + $0x78] sm:$0xff] %v1192_v46 }
 0x268   : > { %1201 = vst [vmem:[%s2378_s28 + $0x30] sm:$0xff] %v1147_v20  ;;  %1209 = vst [vmem:[%s2378_s28 + $0x70] sm:$0xff] %v1187_v4 }
 0x269   : > { %1609 = shalt.err (!%p1606_p6)
}
 0x26a   : > { %s1610_s10 = scalar_lea.hbm %s2398_s21, 2048  ;;  %s1614_s8 = scalar_lea.hbm %s2464_s3, 8192 }
 0x26b   : > { %p1611_p7 = scmp.ne.s32.totalorder %s2398_s21, %s1610_s10  ;;  %p1615_p11 = scmp.lt.u32.totalorder %s2398_s21, %s2464_s3 }
 0x26c   : > { %p1616_p12 = scmp.lt.u32.totalorder %s1614_s8, %s1610_s10  ;;  %p1618_p0 = scmp.lt.u32.totalorder %s1610_s10, %s2398_s21 }
 0x26d   : > { %p1612_p9 = pnand %p1611_p7, %p1773_p3 }
 0x26e   : > { %p1617_p13 = por %p1616_p12, %p1615_p11 }
 0x26f   : > { %p1613_p10 = pneg %p1612_p9 }
 0x270   : > { %p1619_p1 = por %p1618_p0, %p1617_p13 }
 0x272   : > { %p1620_p2 = pnand %p1619_p1, %p1613_p10 }
 0x274   : > { %1623 = shalt.err (!%p1620_p2)
}
 0x275   : > { %s1701_s6 = smov 128  }
 0x276   : > { %1516 = dma.vmem_to_hbm [thread:$0]  (%p1773_p3), %s2400_s5, 2048, %s2398_s21, %s2408_s15, %s1701_s6, %s1701_s6, %s1693_s20  }
 0x277 PF: > { %p1522_p4 = scmp.ge.s32.totalorder %s1690_s19, 2  ;;  %s1242_s7 = sand.u32 1, %s1662_s12  }
 0x278   : > { %s1243_s16 = scalar_lea.sflag [#allocation3], %s1242_s7 }
 0x279   : > { %p1519_p5 = pnand %p1522_p4, %p1782_p8 }
 0x27b   : > { %1657 = dma.done.wait (!%p1519_p5), %s1243_s16, 2048  }
 0x27c   : > { %1659 = vsyncadd (!%p1519_p5), %s1243_s16, 4294965248  ;;  %s16_s19 = sadd.s32 1, %s1690_s19   ;;  %s2485_s12 = smov %s1666_s13 }
 0x27d   : > { %p13_p6 = scmp.ge.s32.totalorder %s16_s19, 6   ;;  %s2486_s13 = smov %s1670_s14 }
 0x27e   : > { %s2487_s14 = smov %s1791_s30  ;;  %s2488_s15 = smov %s1682_s17 }
 0x27f   : > { %s2489_s16 = smov %s1686_s18  ;;  %s2490_s17 = smov %s2493_s22 }
 0x280   : > { %s2491_s18 = smov %s2497_s23  ;;  %15 = sbr.rel (!%p13_p6) target bundleno = 5 (0x5), region = 70 }
 0x287   :  { %1248 = vsyncpa [#allocation3], 1 }
 0x288   :  { %1250 = vsyncpa [#allocation3 + $0x1], 1 }

</bundles_post_ra>
